<compile_context>
chip_gen: v6e
topology: v6e:2x2x1
jax: 0.10.0
libtpu: 0.0.40
codegen_flags: <defaults>
</compile_context>

<pallas_src>
import functools

import jax
import jax.numpy as jnp
from jax.experimental import pallas as pl
from jax.experimental.pallas import tpu as pltpu


def _residual_block_kernel(x_ref, w1_ref, b1_ref, w2_ref, b2_ref, out_ref,
                           *, H, W, eps):
    # x_ref / out_ref : (1, C, H*W) f32  (lane-dense flattened spatial axis)
    # w{1,2}_ref      : (9, C, C)   f32  (w[k, o, c], k = ky*3 + kx)
    # b{1,2}_ref      : (C, 1)      f32
    C, HW = x_ref.shape[1], x_ref.shape[2]

    x = x_ref[0]                                             # (C, HW)

    # Edge masks: computed once, reused by both conv stages (hoisted
    # broadcasts — JAX does not CSE broadcast_in_dim).
    col = jax.lax.broadcasted_iota(jnp.int32, (C, HW), 1)
    w_id = col % W
    top = col < W                      # h == 0
    bot = col >= HW - W                # h == H-1
    left = w_id == 0                   # w == 0
    right = w_id == W - 1              # w == W-1

    def taps9(a):
        """The 9 reflect-padded 3x3 window shifts of a (C, HW) slab.

        Rolls run on the XLU; jnp.where fixes the reflected border columns /
        rows. tap[ky*3+kx][c, h*W+w] == a_2d[c, refl(h+ky-1), refl(w+kx-1)].
        """
        up = pltpu.roll(a, W, 1)                 # value at (h-1, w), interior
        dn = pltpu.roll(a, HW - W, 1)            # value at (h+1, w), interior
        r_m1 = jnp.where(top, dn, up)            # dy = -1 (reflect h=0 -> 1)
        r_p1 = jnp.where(bot, up, dn)            # dy = +1 (reflect h=H-1 -> H-2)
        taps = []
        for r in (r_m1, a, r_p1):                # ky = 0, 1, 2
            lm = pltpu.roll(r, 1, 1)             # value at (., w-1), interior
            lp = pltpu.roll(r, HW - 1, 1)        # value at (., w+1), interior
            taps.append(jnp.where(left, lp, lm))     # kx = 0
            taps.append(r)                           # kx = 1
            taps.append(jnp.where(right, lm, lp))    # kx = 2
        return taps

    def conv3x3(taps, w_ref, b_ref):
        # out[o, :] = sum_{k, c} w[k, o, c] * taps[k][c, :] + b[o]
        # Nine tiny MXU matmuls; every shifted slab is used exactly once for
        # all output channels. Bias added once, outside the tap loop.
        acc = jnp.zeros((C, HW), jnp.float32)
        for k in range(9):
            acc = acc + jnp.dot(w_ref[k], taps[k],
                                preferred_element_type=jnp.float32)
        return acc + b_ref[...]                  # (C, 1) broadcast over HW

    def instance_norm(a):
        # Fused single-pass statistics: var = E[x^2] - mean^2.
        inv_n = 1.0 / float(HW)
        s1 = jnp.sum(a, axis=1, keepdims=True)
        s2 = jnp.sum(a * a, axis=1, keepdims=True)
        m = s1 * inv_n
        var = s2 * inv_n - m * m
        return (a - m) * jax.lax.rsqrt(var + eps)

    y = conv3x3(taps9(x), w1_ref, b1_ref)
    y = jnp.maximum(instance_norm(y), 0.0)
    z = conv3x3(taps9(y), w2_ref, b2_ref)
    z = instance_norm(z)
    out_ref[0] = (x + z).astype(out_ref.dtype)   # full 256-lane store


def residual_block(x, w1, b1, w2, b2, *, eps=1e-5):
    N, C, H, W = x.shape
    HW = H * W
    x_flat = x.reshape(N, C, HW)                 # free, contiguous

    def prep_w(w):   # (O, C, 3, 3) -> (9, O, C), k = ky*3 + kx
        return jnp.transpose(w, (2, 3, 0, 1)).reshape(9, C, C)

    kernel = functools.partial(_residual_block_kernel, H=H, W=W, eps=eps)
    out_flat = pl.pallas_call(
        kernel,
        out_shape=jax.ShapeDtypeStruct((N, C, HW), x.dtype),
        grid=(N,),
        in_specs=[
            pl.BlockSpec((1, C, HW), lambda n: (n, 0, 0)),
            pl.BlockSpec((9, C, C), lambda n: (0, 0, 0)),
            pl.BlockSpec((C, 1), lambda n: (0, 0)),
            pl.BlockSpec((9, C, C), lambda n: (0, 0, 0)),
            pl.BlockSpec((C, 1), lambda n: (0, 0)),
        ],
        out_specs=pl.BlockSpec((1, C, HW), lambda n: (n, 0, 0)),
        compiler_params=pltpu.CompilerParams(
            dimension_semantics=("parallel",)),
    )(x_flat, prep_w(w1), b1.reshape(C, 1), prep_w(w2), b2.reshape(C, 1))
    return out_flat.reshape(N, C, H, W)


def reference(x, w1, b1, w2, b2):
    """Pure-JAX reference mirroring the PyTorch module exactly."""
    eps = 1e-5

    def conv(inp, w, b):
        xp = jnp.pad(inp, ((0, 0), (0, 0), (1, 1), (1, 1)), mode="reflect")
        y = jax.lax.conv_general_dilated(
            xp, w, window_strides=(1, 1), padding="VALID",
            dimension_numbers=("NCHW", "OIHW", "NCHW"))
        return y + b[None, :, None, None]

    def inorm(y):
        m = jnp.mean(y, axis=(2, 3), keepdims=True)
        v = jnp.mean((y - m) ** 2, axis=(2, 3), keepdims=True)
        return (y - m) / jnp.sqrt(v + eps)

    y = jax.nn.relu(inorm(conv(x, w1, b1)))
    y = inorm(conv(y, w2, b2))
    return x + y


if __name__ == "__main__":
    N, C, H, W = 2, 4, 16, 16
    key = jax.random.PRNGKey(0)
    kx, k1, k2, k3, k4 = jax.random.split(key, 5)

    x = jax.random.normal(kx, (N, C, H, W), dtype=jnp.float32)
    fan_in = C * 3 * 3
    w1 = jax.random.normal(k1, (C, C, 3, 3), dtype=jnp.float32) / jnp.sqrt(fan_in)
    b1 = 0.1 * jax.random.normal(k2, (C,), dtype=jnp.float32)
    w2 = jax.random.normal(k3, (C, C, 3, 3), dtype=jnp.float32) / jnp.sqrt(fan_in)
    b2 = 0.1 * jax.random.normal(k4, (C,), dtype=jnp.float32)

    out = jax.jit(residual_block)(x, w1, b1, w2, b2)
    out = jax.block_until_ready(out)

    ref = reference(x, w1, b1, w2, b2)
    assert out.shape == x.shape and out.dtype == x.dtype
    max_err = float(jnp.max(jnp.abs(out - ref)))
    assert max_err < 1e-3, f"mismatch vs reference: max abs err = {max_err}"

    print("KERNEL_OK")
</pallas_src>

<mosaic_0001>
module attributes {stable_mosaic.version = 11 : i64} {
  func.func @_residual_block_kernel(%arg0: i32, %arg1: memref<1x4x256xf32, #tpu.memory_space<vmem>>, %arg2: memref<9x4x4xf32, #tpu.memory_space<vmem>>, %arg3: memref<4x1xf32, #tpu.memory_space<vmem>>, %arg4: memref<9x4x4xf32, #tpu.memory_space<vmem>>, %arg5: memref<4x1xf32, #tpu.memory_space<vmem>>, %arg6: memref<1x4x256xf32, #tpu.memory_space<vmem>>) attributes {dimension_semantics = [#tpu.dimension_semantics<parallel>], iteration_bounds = array<i64: 2>, scalar_prefetch = 0 : i64, scratch_operands = 0 : i64, tpu.core_type = #tpu.core_type<tc>, window_params = [{transform_indices = @transform_0, window_bounds = array<i64: 1, 4, 256>}, {pipeline_mode = #tpu.pipeline_mode<synchronous>, transform_indices = @transform_1, window_bounds = array<i64: 9, 4, 4>}, {pipeline_mode = #tpu.pipeline_mode<synchronous>, transform_indices = @transform_2, window_bounds = array<i64: 4, 1>}, {pipeline_mode = #tpu.pipeline_mode<synchronous>, transform_indices = @transform_3, window_bounds = array<i64: 9, 4, 4>}, {pipeline_mode = #tpu.pipeline_mode<synchronous>, transform_indices = @transform_4, window_bounds = array<i64: 4, 1>}, {transform_indices = @transform_5, window_bounds = array<i64: 1, 4, 256>}]} {
    %c0 = arith.constant 0 : index
    %c0_0 = arith.constant 0 : index
    %c0_1 = arith.constant 0 : index
    %0 = vector.load %arg1[%c0, %c0_0, %c0_1] : memref<1x4x256xf32, #tpu.memory_space<vmem>>, vector<1x4x256xf32>
    %1 = vector.shape_cast %0 : vector<1x4x256xf32> to vector<4x256xf32>
    %2 = tpu.iota {dimensions = array<i32: 1>} : vector<4x256xi32>
    %c16_i32 = arith.constant 16 : i32
    %c0_i32 = arith.constant 0 : i32
    %3 = arith.cmpi eq, %c16_i32, %c0_i32 : i32
    %c1_i32 = arith.constant 1 : i32
    %4 = arith.select %3, %c1_i32, %c16_i32 : i32
    %5 = vector.broadcast %4 : i32 to vector<4x256xi32>
    %6 = arith.remsi %2, %5 : vector<4x256xi32>
    %c0_i32_2 = arith.constant 0 : i32
    %7 = vector.broadcast %c0_i32_2 : i32 to vector<4x256xi32>
    %8 = arith.cmpi ne, %6, %7 : vector<4x256xi32>
    %c0_i32_3 = arith.constant 0 : i32
    %9 = vector.broadcast %c0_i32_3 : i32 to vector<4x256xi32>
    %10 = arith.cmpi slt, %6, %9 : vector<4x256xi32>
    %c0_i32_4 = arith.constant 0 : i32
    %11 = arith.cmpi slt, %4, %c0_i32_4 : i32
    %12 = vector.broadcast %11 : i1 to vector<4x256xi1>
    %13 = vector.broadcast %12 : vector<4x256xi1> to vector<4x256xi1>
    %14 = arith.xori %10, %13 : vector<4x256xi1>
    %15 = arith.andi %14, %8 : vector<4x256xi1>
    %16 = vector.broadcast %4 : i32 to vector<4x256xi32>
    %17 = arith.addi %6, %16 : vector<4x256xi32>
    %18 = arith.select %15, %17, %6 : vector<4x256xi1>, vector<4x256xi32>
    %c16_i32_5 = arith.constant 16 : i32
    %19 = vector.broadcast %c16_i32_5 : i32 to vector<4x256xi32>
    %20 = arith.cmpi slt, %2, %19 : vector<4x256xi32>
    %c240_i32 = arith.constant 240 : i32
    %21 = vector.broadcast %c240_i32 : i32 to vector<4x256xi32>
    %22 = arith.cmpi sge, %2, %21 : vector<4x256xi32>
    %c0_i32_6 = arith.constant 0 : i32
    %23 = vector.broadcast %c0_i32_6 : i32 to vector<4x256xi32>
    %24 = arith.cmpi eq, %18, %23 : vector<4x256xi32>
    %c15_i32 = arith.constant 15 : i32
    %25 = vector.broadcast %c15_i32 : i32 to vector<4x256xi32>
    %26 = arith.cmpi eq, %18, %25 : vector<4x256xi32>
    %c16_i32_7 = arith.constant 16 : i32
    %27 = tpu.dynamic_rotate %1 by %c16_i32_7 dim 1 : vector<4x256xf32>, i32 -> vector<4x256xf32>
    %c240_i32_8 = arith.constant 240 : i32
    %28 = tpu.dynamic_rotate %1 by %c240_i32_8 dim 1 : vector<4x256xf32>, i32 -> vector<4x256xf32>
    %29 = arith.select %20, %28, %27 : vector<4x256xi1>, vector<4x256xf32>
    %30 = arith.select %22, %27, %28 : vector<4x256xi1>, vector<4x256xf32>
    %c1_i32_9 = arith.constant 1 : i32
    %31 = tpu.dynamic_rotate %29 by %c1_i32_9 dim 1 : vector<4x256xf32>, i32 -> vector<4x256xf32>
    %c255_i32 = arith.constant 255 : i32
    %32 = tpu.dynamic_rotate %29 by %c255_i32 dim 1 : vector<4x256xf32>, i32 -> vector<4x256xf32>
    %33 = arith.select %24, %32, %31 : vector<4x256xi1>, vector<4x256xf32>
    %34 = arith.select %26, %31, %32 : vector<4x256xi1>, vector<4x256xf32>
    %c1_i32_10 = arith.constant 1 : i32
    %35 = tpu.dynamic_rotate %1 by %c1_i32_10 dim 1 : vector<4x256xf32>, i32 -> vector<4x256xf32>
    %c255_i32_11 = arith.constant 255 : i32
    %36 = tpu.dynamic_rotate %1 by %c255_i32_11 dim 1 : vector<4x256xf32>, i32 -> vector<4x256xf32>
    %37 = arith.select %24, %36, %35 : vector<4x256xi1>, vector<4x256xf32>
    %38 = arith.select %26, %35, %36 : vector<4x256xi1>, vector<4x256xf32>
    %c1_i32_12 = arith.constant 1 : i32
    %39 = tpu.dynamic_rotate %30 by %c1_i32_12 dim 1 : vector<4x256xf32>, i32 -> vector<4x256xf32>
    %c255_i32_13 = arith.constant 255 : i32
    %40 = tpu.dynamic_rotate %30 by %c255_i32_13 dim 1 : vector<4x256xf32>, i32 -> vector<4x256xf32>
    %41 = arith.select %24, %40, %39 : vector<4x256xi1>, vector<4x256xf32>
    %42 = arith.select %26, %39, %40 : vector<4x256xi1>, vector<4x256xf32>
    %cst = arith.constant 0.000000e+00 : f32
    %43 = vector.broadcast %cst : f32 to vector<4x256xf32>
    %c0_14 = arith.constant 0 : index
    %c0_15 = arith.constant 0 : index
    %c0_16 = arith.constant 0 : index
    %44 = vector.load %arg2[%c0_14, %c0_15, %c0_16] : memref<9x4x4xf32, #tpu.memory_space<vmem>>, vector<1x4x4xf32>
    %45 = vector.shape_cast %44 : vector<1x4x4xf32> to vector<4x4xf32>
    %cst_17 = arith.constant dense<0.000000e+00> : vector<4x256xf32>
    %46 = tpu.matmul %45, %33, %cst_17 {dimension_numbers = #tpu.dot_dimension_numbers<[1], [0], [0], [1], [0, 0, 1, 1], [], []>} : vector<4x4xf32>, vector<4x256xf32>, vector<4x256xf32> -> vector<4x256xf32>
    %47 = arith.addf %43, %46 : vector<4x256xf32>
    %c1 = arith.constant 1 : index
    %c0_18 = arith.constant 0 : index
    %c0_19 = arith.constant 0 : index
    %48 = vector.load %arg2[%c1, %c0_18, %c0_19] : memref<9x4x4xf32, #tpu.memory_space<vmem>>, vector<1x4x4xf32>
    %49 = vector.shape_cast %48 : vector<1x4x4xf32> to vector<4x4xf32>
    %cst_20 = arith.constant dense<0.000000e+00> : vector<4x256xf32>
    %50 = tpu.matmul %49, %29, %cst_20 {dimension_numbers = #tpu.dot_dimension_numbers<[1], [0], [0], [1], [0, 0, 1, 1], [], []>} : vector<4x4xf32>, vector<4x256xf32>, vector<4x256xf32> -> vector<4x256xf32>
    %51 = arith.addf %47, %50 : vector<4x256xf32>
    %c2 = arith.constant 2 : index
    %c0_21 = arith.constant 0 : index
    %c0_22 = arith.constant 0 : index
    %52 = vector.load %arg2[%c2, %c0_21, %c0_22] : memref<9x4x4xf32, #tpu.memory_space<vmem>>, vector<1x4x4xf32>
    %53 = vector.shape_cast %52 : vector<1x4x4xf32> to vector<4x4xf32>
    %cst_23 = arith.constant dense<0.000000e+00> : vector<4x256xf32>
    %54 = tpu.matmul %53, %34, %cst_23 {dimension_numbers = #tpu.dot_dimension_numbers<[1], [0], [0], [1], [0, 0, 1, 1], [], []>} : vector<4x4xf32>, vector<4x256xf32>, vector<4x256xf32> -> vector<4x256xf32>
    %55 = arith.addf %51, %54 : vector<4x256xf32>
    %c3 = arith.constant 3 : index
    %c0_24 = arith.constant 0 : index
    %c0_25 = arith.constant 0 : index
    %56 = vector.load %arg2[%c3, %c0_24, %c0_25] : memref<9x4x4xf32, #tpu.memory_space<vmem>>, vector<1x4x4xf32>
    %57 = vector.shape_cast %56 : vector<1x4x4xf32> to vector<4x4xf32>
    %cst_26 = arith.constant dense<0.000000e+00> : vector<4x256xf32>
    %58 = tpu.matmul %57, %37, %cst_26 {dimension_numbers = #tpu.dot_dimension_numbers<[1], [0], [0], [1], [0, 0, 1, 1], [], []>} : vector<4x4xf32>, vector<4x256xf32>, vector<4x256xf32> -> vector<4x256xf32>
    %59 = arith.addf %55, %58 : vector<4x256xf32>
    %c4 = arith.constant 4 : index
    %c0_27 = arith.constant 0 : index
    %c0_28 = arith.constant 0 : index
    %60 = vector.load %arg2[%c4, %c0_27, %c0_28] : memref<9x4x4xf32, #tpu.memory_space<vmem>>, vector<1x4x4xf32>
    %61 = vector.shape_cast %60 : vector<1x4x4xf32> to vector<4x4xf32>
    %cst_29 = arith.constant dense<0.000000e+00> : vector<4x256xf32>
    %62 = tpu.matmul %61, %1, %cst_29 {dimension_numbers = #tpu.dot_dimension_numbers<[1], [0], [0], [1], [0, 0, 1, 1], [], []>} : vector<4x4xf32>, vector<4x256xf32>, vector<4x256xf32> -> vector<4x256xf32>
    %63 = arith.addf %59, %62 : vector<4x256xf32>
    %c5 = arith.constant 5 : index
    %c0_30 = arith.constant 0 : index
    %c0_31 = arith.constant 0 : index
    %64 = vector.load %arg2[%c5, %c0_30, %c0_31] : memref<9x4x4xf32, #tpu.memory_space<vmem>>, vector<1x4x4xf32>
    %65 = vector.shape_cast %64 : vector<1x4x4xf32> to vector<4x4xf32>
    %cst_32 = arith.constant dense<0.000000e+00> : vector<4x256xf32>
    %66 = tpu.matmul %65, %38, %cst_32 {dimension_numbers = #tpu.dot_dimension_numbers<[1], [0], [0], [1], [0, 0, 1, 1], [], []>} : vector<4x4xf32>, vector<4x256xf32>, vector<4x256xf32> -> vector<4x256xf32>
    %67 = arith.addf %63, %66 : vector<4x256xf32>
    %c6 = arith.constant 6 : index
    %c0_33 = arith.constant 0 : index
    %c0_34 = arith.constant 0 : index
    %68 = vector.load %arg2[%c6, %c0_33, %c0_34] : memref<9x4x4xf32, #tpu.memory_space<vmem>>, vector<1x4x4xf32>
    %69 = vector.shape_cast %68 : vector<1x4x4xf32> to vector<4x4xf32>
    %cst_35 = arith.constant dense<0.000000e+00> : vector<4x256xf32>
    %70 = tpu.matmul %69, %41, %cst_35 {dimension_numbers = #tpu.dot_dimension_numbers<[1], [0], [0], [1], [0, 0, 1, 1], [], []>} : vector<4x4xf32>, vector<4x256xf32>, vector<4x256xf32> -> vector<4x256xf32>
    %71 = arith.addf %67, %70 : vector<4x256xf32>
    %c7 = arith.constant 7 : index
    %c0_36 = arith.constant 0 : index
    %c0_37 = arith.constant 0 : index
    %72 = vector.load %arg2[%c7, %c0_36, %c0_37] : memref<9x4x4xf32, #tpu.memory_space<vmem>>, vector<1x4x4xf32>
    %73 = vector.shape_cast %72 : vector<1x4x4xf32> to vector<4x4xf32>
    %cst_38 = arith.constant dense<0.000000e+00> : vector<4x256xf32>
    %74 = tpu.matmul %73, %30, %cst_38 {dimension_numbers = #tpu.dot_dimension_numbers<[1], [0], [0], [1], [0, 0, 1, 1], [], []>} : vector<4x4xf32>, vector<4x256xf32>, vector<4x256xf32> -> vector<4x256xf32>
    %75 = arith.addf %71, %74 : vector<4x256xf32>
    %c8 = arith.constant 8 : index
    %c0_39 = arith.constant 0 : index
    %c0_40 = arith.constant 0 : index
    %76 = vector.load %arg2[%c8, %c0_39, %c0_40] : memref<9x4x4xf32, #tpu.memory_space<vmem>>, vector<1x4x4xf32>
    %77 = vector.shape_cast %76 : vector<1x4x4xf32> to vector<4x4xf32>
    %cst_41 = arith.constant dense<0.000000e+00> : vector<4x256xf32>
    %78 = tpu.matmul %77, %42, %cst_41 {dimension_numbers = #tpu.dot_dimension_numbers<[1], [0], [0], [1], [0, 0, 1, 1], [], []>} : vector<4x4xf32>, vector<4x256xf32>, vector<4x256xf32> -> vector<4x256xf32>
    %79 = arith.addf %75, %78 : vector<4x256xf32>
    %c0_42 = arith.constant 0 : index
    %c0_43 = arith.constant 0 : index
    %80 = vector.load %arg3[%c0_42, %c0_43] : memref<4x1xf32, #tpu.memory_space<vmem>>, vector<4x1xf32>
    %81 = vector.broadcast %80 : vector<4x1xf32> to vector<4x256xf32>
    %82 = arith.addf %79, %81 : vector<4x256xf32>
    %cst_44 = arith.constant dense<0.000000e+00> : vector<4xf32>
    %83 = vector.multi_reduction <add>, %82, %cst_44 [1] : vector<4x256xf32> to vector<4xf32>
    %84 = vector.shape_cast %83 : vector<4xf32> to vector<4x1xf32>
    %85 = arith.mulf %82, %82 : vector<4x256xf32>
    %cst_45 = arith.constant dense<0.000000e+00> : vector<4xf32>
    %86 = vector.multi_reduction <add>, %85, %cst_45 [1] : vector<4x256xf32> to vector<4xf32>
    %87 = vector.shape_cast %86 : vector<4xf32> to vector<4x1xf32>
    %cst_46 = arith.constant 3.906250e-03 : f32
    %88 = vector.broadcast %cst_46 : f32 to vector<4x1xf32>
    %89 = arith.mulf %84, %88 : vector<4x1xf32>
    %cst_47 = arith.constant 3.906250e-03 : f32
    %90 = vector.broadcast %cst_47 : f32 to vector<4x1xf32>
    %91 = arith.mulf %87, %90 : vector<4x1xf32>
    %92 = arith.mulf %89, %89 : vector<4x1xf32>
    %93 = arith.subf %91, %92 : vector<4x1xf32>
    %94 = vector.broadcast %89 : vector<4x1xf32> to vector<4x256xf32>
    %95 = arith.subf %82, %94 : vector<4x256xf32>
    %cst_48 = arith.constant 9.99999974E-6 : f32
    %96 = vector.broadcast %cst_48 : f32 to vector<4x1xf32>
    %97 = arith.addf %93, %96 : vector<4x1xf32>
    %98 = math.rsqrt %97 : vector<4x1xf32>
    %99 = vector.broadcast %98 : vector<4x1xf32> to vector<4x256xf32>
    %100 = arith.mulf %95, %99 : vector<4x256xf32>
    %cst_49 = arith.constant 0.000000e+00 : f32
    %101 = vector.broadcast %cst_49 : f32 to vector<4x256xf32>
    %102 = arith.maximumf %100, %101 : vector<4x256xf32>
    %c16_i32_50 = arith.constant 16 : i32
    %103 = tpu.dynamic_rotate %102 by %c16_i32_50 dim 1 : vector<4x256xf32>, i32 -> vector<4x256xf32>
    %c240_i32_51 = arith.constant 240 : i32
    %104 = tpu.dynamic_rotate %102 by %c240_i32_51 dim 1 : vector<4x256xf32>, i32 -> vector<4x256xf32>
    %105 = arith.select %20, %104, %103 : vector<4x256xi1>, vector<4x256xf32>
    %106 = arith.select %22, %103, %104 : vector<4x256xi1>, vector<4x256xf32>
    %c1_i32_52 = arith.constant 1 : i32
    %107 = tpu.dynamic_rotate %105 by %c1_i32_52 dim 1 : vector<4x256xf32>, i32 -> vector<4x256xf32>
    %c255_i32_53 = arith.constant 255 : i32
    %108 = tpu.dynamic_rotate %105 by %c255_i32_53 dim 1 : vector<4x256xf32>, i32 -> vector<4x256xf32>
    %109 = arith.select %24, %108, %107 : vector<4x256xi1>, vector<4x256xf32>
    %110 = arith.select %26, %107, %108 : vector<4x256xi1>, vector<4x256xf32>
    %c1_i32_54 = arith.constant 1 : i32
    %111 = tpu.dynamic_rotate %102 by %c1_i32_54 dim 1 : vector<4x256xf32>, i32 -> vector<4x256xf32>
    %c255_i32_55 = arith.constant 255 : i32
    %112 = tpu.dynamic_rotate %102 by %c255_i32_55 dim 1 : vector<4x256xf32>, i32 -> vector<4x256xf32>
    %113 = arith.select %24, %112, %111 : vector<4x256xi1>, vector<4x256xf32>
    %114 = arith.select %26, %111, %112 : vector<4x256xi1>, vector<4x256xf32>
    %c1_i32_56 = arith.constant 1 : i32
    %115 = tpu.dynamic_rotate %106 by %c1_i32_56 dim 1 : vector<4x256xf32>, i32 -> vector<4x256xf32>
    %c255_i32_57 = arith.constant 255 : i32
    %116 = tpu.dynamic_rotate %106 by %c255_i32_57 dim 1 : vector<4x256xf32>, i32 -> vector<4x256xf32>
    %117 = arith.select %24, %116, %115 : vector<4x256xi1>, vector<4x256xf32>
    %118 = arith.select %26, %115, %116 : vector<4x256xi1>, vector<4x256xf32>
    %cst_58 = arith.constant 0.000000e+00 : f32
    %119 = vector.broadcast %cst_58 : f32 to vector<4x256xf32>
    %c0_59 = arith.constant 0 : index
    %c0_60 = arith.constant 0 : index
    %c0_61 = arith.constant 0 : index
    %120 = vector.load %arg4[%c0_59, %c0_60, %c0_61] : memref<9x4x4xf32, #tpu.memory_space<vmem>>, vector<1x4x4xf32>
    %121 = vector.shape_cast %120 : vector<1x4x4xf32> to vector<4x4xf32>
    %cst_62 = arith.constant dense<0.000000e+00> : vector<4x256xf32>
    %122 = tpu.matmul %121, %109, %cst_62 {dimension_numbers = #tpu.dot_dimension_numbers<[1], [0], [0], [1], [0, 0, 1, 1], [], []>} : vector<4x4xf32>, vector<4x256xf32>, vector<4x256xf32> -> vector<4x256xf32>
    %123 = arith.addf %119, %122 : vector<4x256xf32>
    %c1_63 = arith.constant 1 : index
    %c0_64 = arith.constant 0 : index
    %c0_65 = arith.constant 0 : index
    %124 = vector.load %arg4[%c1_63, %c0_64, %c0_65] : memref<9x4x4xf32, #tpu.memory_space<vmem>>, vector<1x4x4xf32>
    %125 = vector.shape_cast %124 : vector<1x4x4xf32> to vector<4x4xf32>
    %cst_66 = arith.constant dense<0.000000e+00> : vector<4x256xf32>
    %126 = tpu.matmul %125, %105, %cst_66 {dimension_numbers = #tpu.dot_dimension_numbers<[1], [0], [0], [1], [0, 0, 1, 1], [], []>} : vector<4x4xf32>, vector<4x256xf32>, vector<4x256xf32> -> vector<4x256xf32>
    %127 = arith.addf %123, %126 : vector<4x256xf32>
    %c2_67 = arith.constant 2 : index
    %c0_68 = arith.constant 0 : index
    %c0_69 = arith.constant 0 : index
    %128 = vector.load %arg4[%c2_67, %c0_68, %c0_69] : memref<9x4x4xf32, #tpu.memory_space<vmem>>, vector<1x4x4xf32>
    %129 = vector.shape_cast %128 : vector<1x4x4xf32> to vector<4x4xf32>
    %cst_70 = arith.constant dense<0.000000e+00> : vector<4x256xf32>
    %130 = tpu.matmul %129, %110, %cst_70 {dimension_numbers = #tpu.dot_dimension_numbers<[1], [0], [0], [1], [0, 0, 1, 1], [], []>} : vector<4x4xf32>, vector<4x256xf32>, vector<4x256xf32> -> vector<4x256xf32>
    %131 = arith.addf %127, %130 : vector<4x256xf32>
    %c3_71 = arith.constant 3 : index
    %c0_72 = arith.constant 0 : index
    %c0_73 = arith.constant 0 : index
    %132 = vector.load %arg4[%c3_71, %c0_72, %c0_73] : memref<9x4x4xf32, #tpu.memory_space<vmem>>, vector<1x4x4xf32>
    %133 = vector.shape_cast %132 : vector<1x4x4xf32> to vector<4x4xf32>
    %cst_74 = arith.constant dense<0.000000e+00> : vector<4x256xf32>
    %134 = tpu.matmul %133, %113, %cst_74 {dimension_numbers = #tpu.dot_dimension_numbers<[1], [0], [0], [1], [0, 0, 1, 1], [], []>} : vector<4x4xf32>, vector<4x256xf32>, vector<4x256xf32> -> vector<4x256xf32>
    %135 = arith.addf %131, %134 : vector<4x256xf32>
    %c4_75 = arith.constant 4 : index
    %c0_76 = arith.constant 0 : index
    %c0_77 = arith.constant 0 : index
    %136 = vector.load %arg4[%c4_75, %c0_76, %c0_77] : memref<9x4x4xf32, #tpu.memory_space<vmem>>, vector<1x4x4xf32>
    %137 = vector.shape_cast %136 : vector<1x4x4xf32> to vector<4x4xf32>
    %cst_78 = arith.constant dense<0.000000e+00> : vector<4x256xf32>
    %138 = tpu.matmul %137, %102, %cst_78 {dimension_numbers = #tpu.dot_dimension_numbers<[1], [0], [0], [1], [0, 0, 1, 1], [], []>} : vector<4x4xf32>, vector<4x256xf32>, vector<4x256xf32> -> vector<4x256xf32>
    %139 = arith.addf %135, %138 : vector<4x256xf32>
    %c5_79 = arith.constant 5 : index
    %c0_80 = arith.constant 0 : index
    %c0_81 = arith.constant 0 : index
    %140 = vector.load %arg4[%c5_79, %c0_80, %c0_81] : memref<9x4x4xf32, #tpu.memory_space<vmem>>, vector<1x4x4xf32>
    %141 = vector.shape_cast %140 : vector<1x4x4xf32> to vector<4x4xf32>
    %cst_82 = arith.constant dense<0.000000e+00> : vector<4x256xf32>
    %142 = tpu.matmul %141, %114, %cst_82 {dimension_numbers = #tpu.dot_dimension_numbers<[1], [0], [0], [1], [0, 0, 1, 1], [], []>} : vector<4x4xf32>, vector<4x256xf32>, vector<4x256xf32> -> vector<4x256xf32>
    %143 = arith.addf %139, %142 : vector<4x256xf32>
    %c6_83 = arith.constant 6 : index
    %c0_84 = arith.constant 0 : index
    %c0_85 = arith.constant 0 : index
    %144 = vector.load %arg4[%c6_83, %c0_84, %c0_85] : memref<9x4x4xf32, #tpu.memory_space<vmem>>, vector<1x4x4xf32>
    %145 = vector.shape_cast %144 : vector<1x4x4xf32> to vector<4x4xf32>
    %cst_86 = arith.constant dense<0.000000e+00> : vector<4x256xf32>
    %146 = tpu.matmul %145, %117, %cst_86 {dimension_numbers = #tpu.dot_dimension_numbers<[1], [0], [0], [1], [0, 0, 1, 1], [], []>} : vector<4x4xf32>, vector<4x256xf32>, vector<4x256xf32> -> vector<4x256xf32>
    %147 = arith.addf %143, %146 : vector<4x256xf32>
    %c7_87 = arith.constant 7 : index
    %c0_88 = arith.constant 0 : index
    %c0_89 = arith.constant 0 : index
    %148 = vector.load %arg4[%c7_87, %c0_88, %c0_89] : memref<9x4x4xf32, #tpu.memory_space<vmem>>, vector<1x4x4xf32>
    %149 = vector.shape_cast %148 : vector<1x4x4xf32> to vector<4x4xf32>
    %cst_90 = arith.constant dense<0.000000e+00> : vector<4x256xf32>
    %150 = tpu.matmul %149, %106, %cst_90 {dimension_numbers = #tpu.dot_dimension_numbers<[1], [0], [0], [1], [0, 0, 1, 1], [], []>} : vector<4x4xf32>, vector<4x256xf32>, vector<4x256xf32> -> vector<4x256xf32>
    %151 = arith.addf %147, %150 : vector<4x256xf32>
    %c8_91 = arith.constant 8 : index
    %c0_92 = arith.constant 0 : index
    %c0_93 = arith.constant 0 : index
    %152 = vector.load %arg4[%c8_91, %c0_92, %c0_93] : memref<9x4x4xf32, #tpu.memory_space<vmem>>, vector<1x4x4xf32>
    %153 = vector.shape_cast %152 : vector<1x4x4xf32> to vector<4x4xf32>
    %cst_94 = arith.constant dense<0.000000e+00> : vector<4x256xf32>
    %154 = tpu.matmul %153, %118, %cst_94 {dimension_numbers = #tpu.dot_dimension_numbers<[1], [0], [0], [1], [0, 0, 1, 1], [], []>} : vector<4x4xf32>, vector<4x256xf32>, vector<4x256xf32> -> vector<4x256xf32>
    %155 = arith.addf %151, %154 : vector<4x256xf32>
    %c0_95 = arith.constant 0 : index
    %c0_96 = arith.constant 0 : index
    %156 = vector.load %arg5[%c0_95, %c0_96] : memref<4x1xf32, #tpu.memory_space<vmem>>, vector<4x1xf32>
    %157 = vector.broadcast %156 : vector<4x1xf32> to vector<4x256xf32>
    %158 = arith.addf %155, %157 : vector<4x256xf32>
    %cst_97 = arith.constant dense<0.000000e+00> : vector<4xf32>
    %159 = vector.multi_reduction <add>, %158, %cst_97 [1] : vector<4x256xf32> to vector<4xf32>
    %160 = vector.shape_cast %159 : vector<4xf32> to vector<4x1xf32>
    %161 = arith.mulf %158, %158 : vector<4x256xf32>
    %cst_98 = arith.constant dense<0.000000e+00> : vector<4xf32>
    %162 = vector.multi_reduction <add>, %161, %cst_98 [1] : vector<4x256xf32> to vector<4xf32>
    %163 = vector.shape_cast %162 : vector<4xf32> to vector<4x1xf32>
    %cst_99 = arith.constant 3.906250e-03 : f32
    %164 = vector.broadcast %cst_99 : f32 to vector<4x1xf32>
    %165 = arith.mulf %160, %164 : vector<4x1xf32>
    %cst_100 = arith.constant 3.906250e-03 : f32
    %166 = vector.broadcast %cst_100 : f32 to vector<4x1xf32>
    %167 = arith.mulf %163, %166 : vector<4x1xf32>
    %168 = arith.mulf %165, %165 : vector<4x1xf32>
    %169 = arith.subf %167, %168 : vector<4x1xf32>
    %170 = vector.broadcast %165 : vector<4x1xf32> to vector<4x256xf32>
    %171 = arith.subf %158, %170 : vector<4x256xf32>
    %cst_101 = arith.constant 9.99999974E-6 : f32
    %172 = vector.broadcast %cst_101 : f32 to vector<4x1xf32>
    %173 = arith.addf %169, %172 : vector<4x1xf32>
    %174 = math.rsqrt %173 : vector<4x1xf32>
    %175 = vector.broadcast %174 : vector<4x1xf32> to vector<4x256xf32>
    %176 = arith.mulf %171, %175 : vector<4x256xf32>
    %177 = arith.addf %1, %176 : vector<4x256xf32>
    %c0_102 = arith.constant 0 : index
    %c0_103 = arith.constant 0 : index
    %c0_104 = arith.constant 0 : index
    %178 = vector.load %arg6[%c0_102, %c0_103, %c0_104] : memref<1x4x256xf32, #tpu.memory_space<vmem>>, vector<1x4x256xf32>
    %179 = vector.shape_cast %178 : vector<1x4x256xf32> to vector<4x256xf32>
    %180 = vector.shape_cast %177 : vector<4x256xf32> to vector<1x4x256xf32>
    tpu.vector_store %arg6[%c0_102, %c0_103, %c0_104], %180 {strides = array<i32>} : memref<1x4x256xf32, #tpu.memory_space<vmem>>, vector<1x4x256xf32>,
    return
  }
  func.func @transform_0(%arg0: i32) -> (i32, i32, i32) {
    %c0_i32 = arith.constant 0 : i32
    %c0_i32_0 = arith.constant 0 : i32
    %c0_i32_1 = arith.constant 0 : i32
    return %arg0, %c0_i32, %c0_i32_0 : i32, i32, i32
  }
  func.func @transform_1(%arg0: i32) -> (i32, i32, i32) {
    %c0_i32 = arith.constant 0 : i32
    %c0_i32_0 = arith.constant 0 : i32
    %c0_i32_1 = arith.constant 0 : i32
    %c0_i32_2 = arith.constant 0 : i32
    return %c0_i32, %c0_i32_0, %c0_i32_1 : i32, i32, i32
  }
  func.func @transform_2(%arg0: i32) -> (i32, i32) {
    %c0_i32 = arith.constant 0 : i32
    %c0_i32_0 = arith.constant 0 : i32
    %c0_i32_1 = arith.constant 0 : i32
    return %c0_i32, %c0_i32_0 : i32, i32
  }
  func.func @transform_3(%arg0: i32) -> (i32, i32, i32) {
    %c0_i32 = arith.constant 0 : i32
    %c0_i32_0 = arith.constant 0 : i32
    %c0_i32_1 = arith.constant 0 : i32
    %c0_i32_2 = arith.constant 0 : i32
    return %c0_i32, %c0_i32_0, %c0_i32_1 : i32, i32, i32
  }
  func.func @transform_4(%arg0: i32) -> (i32, i32) {
    %c0_i32 = arith.constant 0 : i32
    %c0_i32_0 = arith.constant 0 : i32
    %c0_i32_1 = arith.constant 0 : i32
    return %c0_i32, %c0_i32_0 : i32, i32
  }
  func.func @transform_5(%arg0: i32) -> (i32, i32, i32) {
    %c0_i32 = arith.constant 0 : i32
    %c0_i32_0 = arith.constant 0 : i32
    %c0_i32_1 = arith.constant 0 : i32
    return %arg0, %c0_i32, %c0_i32_0 : i32, i32, i32
  }
}

</mosaic_0001>

<bundles_post_ra>
// kernel: residual_block.1
= control target key start
LH: loop header
LB: loop body
LE: loop exit
PB: predicated region body
PF: predicated region fallthrough
CT: control target
= control target key end

     0   :  { %s2167_s18 = smov 0   ;;  %s2552_s0 = inlined_call_operand.vmem [shape: f32[2,4,256], index: 0, kind: input, shape index: {}]   ;;  %s2553_s1 = inlined_call_operand.vmem [shape: f32[9,4,4], index: 1, kind: input, shape index: {}]   ;;  %s2554_s2 = inlined_call_operand.vmem [shape: f32[4,1], index: 2, kind: input, shape index: {}]   ;;  %s2555_s3 = inlined_call_operand.vmem [shape: f32[9,4,4], index: 3, kind: input, shape index: {}]   ;;  %s2556_s4 = inlined_call_operand.vmem [shape: f32[4,1], index: 4, kind: input, shape index: {}]   ;;  %s2557_s5 = inlined_call_operand.vmem [shape: f32[2,4,256], index: 5, kind: output, shape index: {}]  }
   0x1 LB: > { %s2020_s19 = sadd.s32 4294967295, %s2129_s18   ;;  %p2024_p0 = scmp.ge.s32.totalorder %s2129_s18, 1  ;;  %s2129_s18 = sphi %s2167_s18, %s15_s18  }
   0x2   : > { %p187_p1 = scmp.lt.s32.totalorder %s2129_s18, 3 }
   0x4   : > { %p188_p2 = pnand %p2024_p0, %p187_p1 }
   0x5   : > { %p215_p3 = scmp.lt.s32.totalorder (!%p188_p2), %s2020_s19, 1  ;;  %s2131_s24 = smov (!%p188_p2), 112  }
   0x6   : > { %191 = sbr.rel (%p188_p2) target bundleno = 1274 (0x4fa), region = 40  ;;  %s2132_s25 = smov (!%p188_p2), 16  }
   0x7   : > { %s2133_s26 = smov (!%p188_p2), 1   ;;  %s2135_s29 = smov (!%p188_p2), 127  }
   0xb   : > { %s2567_s19 = smov (!%p215_p3, %s2020_s19), 1  ;;  %v226_v2 = vlaneseq  ;;  %v2134_v4 = vmov 0.0   ;;  %vm338_vm2 = vcmask 1043456   ;;  %v2029_v12 = vld [vmem:[%s2553_s1 + $0x4] sm:$0xf]  ;;  %vm334_vm3 = vcmask 31744  }
   0xc   : > { %s2101_s20 = sshll.u32 %s2567_s19, 3  ;;  %409 = vmatprep.mubr.f32.mxu0 %v2134_v4  ;;  %489 = vmatprep.mubr.f32.mxu1 %v2134_v4  ;;  %v2136_v17 = vmov 0   ;;  %v1082_v18 = vld [vmem:[%s2554_s2] sm:$0xf]  ;;  %v2036_v40 = vld [vmem:[%s2553_s1 + $0x8] sm:$0xf] }
   0xd   : > { %s219_s23 = scalar_lea.vmem %s2552_s0, %s2101_s20  ;;  %v2201_v3 = vand.u32 127, %v226_v2  ;;  %2117 = vset.pattern.permute.xlu0 %v2136_v17  ;;  %v331_v39 = vld [vmem:[%s2553_s1] sm:$0xf]  ;;  %v2040_v49 = vld [vmem:[%s2553_s1 + $0xc] sm:$0xf] }
   0xe   : > { %v2183_v0 = vld [vmem:[%s219_s23] sm:$0xff]  ;;  %v2044_v51 = vld [vmem:[%s2553_s1 + $0x10] sm:$0xf]  ;;  %v2048_v55 = vld [vmem:[%s2553_s1 + $0x14] sm:$0xf] }
   0xf   : > { %270 = vrot.lane.b32.xlu1 %v2183_v0, %s2131_s24  ;;  %264 = vrot.lane.b32.xlu0 %v2183_v0, %s2132_s25  ;;  %v2191_v1 = vcombine.high %v2183_v0, %v2183_v0  ;;  %vm274_vm0 = vcmp.lt.s32.totalorder %v2201_v3, 112  ;;  %vm253_vm1 = vcmp.lt.s32.totalorder %v2201_v3, 16  ;;  %v2229_v14 = vadd.s32 128, %v2201_v3  ;;  %v2056_v2 = vld [vmem:[%s2553_s1 + $0x1c] sm:$0xf] }
  0x10   : > { %v233_v23 = vand.u32 15, %v2201_v3  ;;  %vm292_vm5 = vcmp.lt.s32.totalorder %v2201_v3, 127  ;;  %vm285_vm10 = vcmp.lt.s32.totalorder %v2201_v3, 1  ;;  %v2091_v3 = vld [vmem:[%s2555_s3 + $0x1c] sm:$0xf] }
  0x11   : > { %vm256_vm4 = vcmp.ge.s32.totalorder %v2229_v14, 240  ;;  %v240_v21 = vand.u32 15, %v2229_v14  ;;  %v1929_v14 = vld [vmem:[%s2556_s4] sm:$0xf] }
  0x12   : > { %vm2261_vm7 = vcmp.eq.s32.totalorder %v233_v23, 15  ;;  %vm2269_vm9 = vcmp.eq.s32.totalorder %v233_v23, 0 }
  0x13   : > { %272 = vrot.lane.b32.xlu1 %v2191_v1, %s2131_s24  ;;  %266 = vrot.lane.b32.xlu0 %v2191_v1, %s2132_s25  ;;  %vm2257_vm6 = vcmp.eq.s32.totalorder %v240_v21, 15  ;;  %vm2265_vm8 = vcmp.eq.s32.totalorder %v240_v21, 0 }
  0x17   : > { %301 = vrot.lane.b32.xlu1 %v2191_v1, %s2133_s26  ;;  %299 = vrot.lane.b32.xlu0 %v2183_v0, %s2133_s26 }
  0x81   : > { %v271_v5 = vpop.permute.xlu1 %270  ;;  %v265_v6 = vpop.permute.xlu0 %264 }
  0x85   : > { %v273_v7 = vpop.permute.xlu1 %272  ;;  %v267_v8 = vpop.permute.xlu0 %266 }
  0x86   : > { %v2209_v9 = vsel %vm274_vm0, %v271_v5, %v273_v7  ;;  %v268_v10 = vsel %vm253_vm1, %v265_v6, %v267_v8  ;;  %v269_v11 = vsel %vm253_vm1, %v267_v8, %v265_v6  ;;  %v276_v15 = vsel %vm274_vm0, %v273_v7, %v271_v5  ;;  %v2060_v7 = vld [vmem:[%s2553_s1 + $0x20] sm:$0xf] }
  0x87   : > { %283 = vrot.lane.b32.xlu1 %v268_v10, %s2133_s26  ;;  %2030 = vmatprep.subr.msk.mxu0 %vm338_vm2, %v268_v10  ;;  %v277_v13 = vsel %vm253_vm1, %v2209_v9, %v269_v11  ;;  %v2241_v16 = vsel %vm256_vm4, %v268_v10, %v276_v15 }
  0x88   : > { %281 = vrot.lane.b32.xlu0 %v277_v13, %s2133_s26  ;;  %2031 = vmatpush1.msk.msra.mxu0 %vm338_vm2, %v277_v13 }
  0x89   : > { %2032 = vmatmul.mubr.msk.f32.vlgmr.msra.gmra.mxu0 %vm334_vm3, %v2029_v12  ;;  %v302_v19 = vpop.permute.xlu1 %301  ;;  %v300_v20 = vpop.permute.xlu0 %299 }
  0x8a   : > { %571 = vmatprep.mubr.f32.mxu0 %v2134_v4  ;;  %v303_v42 = vsel %vm285_vm10, %v300_v20, %v302_v19  ;;  %v304_v44 = vsel %vm285_vm10, %v302_v19, %v300_v20 }
  0x8b   : > { %290 = vrot.lane.b32.xlu1 %v268_v10, %s2135_s29 }
  0x8c   : > { %288 = vrot.lane.b32.xlu0 %v277_v13, %s2135_s29 }
  0x8f   : > { %307 = vrot.lane.b32.xlu1 %v2191_v1, %s2135_s29 }
  0x90   : > { %305 = vrot.lane.b32.xlu0 %v2183_v0, %s2135_s29 }
  0x93   : > { %317 = vrot.lane.b32.xlu1 %v2241_v16, %s2133_s26 }
  0x94   : > { %315 = vrot.lane.b32.xlu0 %v2209_v9, %s2133_s26 }
  0x97   : > { %323 = vrot.lane.b32.xlu1 %v2241_v16, %s2135_s29 }
  0x98   : > { %321 = vrot.lane.b32.xlu0 %v2209_v9, %s2135_s29 }
  0x9c   : > { %1085 = vperm.xlu0 %2117, %v1082_v18  }
  0xf9   : > { %v284_v22 = vpop.permute.xlu1 %283 }
  0xfa   : > { %v282_v24 = vpop.permute.xlu0 %281 }
  0xfb   : > { %v286_v31 = vsel %vm285_vm10, %v282_v24, %v284_v22  ;;  %v287_v32 = vsel %vm285_vm10, %v284_v22, %v282_v24 }
  0xfd   : > { %v291_v26 = vpop.permute.xlu1 %290 }
  0xfe   : > { %v289_v30 = vpop.permute.xlu0 %288 }
  0xff   : > { %v293_v33 = vsel %vm292_vm5, %v289_v30, %v291_v26  ;;  %v294_v34 = vsel %vm292_vm5, %v291_v26, %v289_v30 }
 0x100   : > { %v297_v35 = vsel %vm2261_vm7, %v287_v32, %v293_v33  ;;  %v296_v36 = vsel %vm2265_vm8, %v294_v34, %v286_v31  ;;  %v298_v37 = vsel %vm2257_vm6, %v286_v31, %v294_v34  ;;  %v295_v38 = vsel %vm2269_vm9, %v293_v33, %v287_v32 }
 0x101   : > { %v308_v41 = vpop.permute.xlu1 %307  ;;  %2033 = vmatprep.subr.msk.mxu1 %vm338_vm2, %v296_v36  ;;  %2037 = vmatprep.subr.msk.mxu0 %vm338_vm2, %v298_v37 }
 0x102   : > { %2034 = vmatpush1.msk.msra.mxu1 %vm338_vm2, %v295_v38  ;;  %2038 = vmatpush1.msk.msra.mxu0 %vm338_vm2, %v297_v35  ;;  %v306_v43 = vpop.permute.xlu0 %305 }
 0x103   : > { %v309_v45 = vsel %vm292_vm5, %v306_v43, %v308_v41  ;;  %v310_v46 = vsel %vm292_vm5, %v308_v41, %v306_v43  ;;  %2035 = vmatmul.mubr.msk.f32.vlgmr.msra.gmra.mxu1 %vm334_vm3, %v331_v39  ;;  %2039 = vmatmul.mubr.msk.f32.vlgmr.msra.gmra.mxu0 %vm334_vm3, %v2036_v40 }
 0x104   : > { %v311_v47 = vsel %vm2269_vm9, %v309_v45, %v304_v44  ;;  %v312_v48 = vsel %vm2265_vm8, %v310_v46, %v303_v42  ;;  %655 = vmatprep.mubr.f32.mxu1 %v2134_v4  ;;  %2045 = vmatprep.subr.msk.mxu0 %vm338_vm2, %v2191_v1  ;;  %v314_v53 = vsel %vm2257_vm6, %v303_v42, %v310_v46  ;;  %v2052_v1 = vld [vmem:[%s2553_s1 + $0x18] sm:$0xf] }
 0x105   : > { %v318_v50 = vpop.permute.xlu1 %317  ;;  %2041 = vmatprep.subr.msk.mxu1 %vm338_vm2, %v312_v48  ;;  %2046 = vmatpush1.msk.msra.mxu0 %vm338_vm2, %v2183_v0  ;;  %v313_v54 = vsel %vm2261_vm7, %v304_v44, %v309_v45 }
 0x106   : > { %2042 = vmatpush1.msk.msra.mxu1 %vm338_vm2, %v311_v47  ;;  %v316_v52 = vpop.permute.xlu0 %315  ;;  %737 = vmatprep.mubr.f32.mxu0 %v2134_v4 }
 0x107   : > { %2043 = vmatmul.mubr.msk.f32.vlgmr.msra.gmra.mxu1 %vm334_vm3, %v2040_v49  ;;  %2049 = vmatprep.subr.msk.mxu1 %vm338_vm2, %v314_v53  ;;  %v319_v58 = vsel %vm285_vm10, %v316_v52, %v318_v50  ;;  %v320_v59 = vsel %vm285_vm10, %v318_v50, %v316_v52 }
 0x108   : > { %2050 = vmatpush1.msk.msra.mxu1 %vm338_vm2, %v313_v54  ;;  %2047 = vmatmul.mubr.msk.f32.vlgmr.msra.gmra.mxu0 %vm334_vm3, %v2044_v51 }
 0x109   : > { %v324_v56 = vpop.permute.xlu1 %323  ;;  %2057 = vmatprep.subr.msk.mxu1 %vm338_vm2, %v2241_v16  ;;  %821 = vmatprep.mubr.f32.mxu1 %v2134_v4 }
 0x10a   : > { %v322_v57 = vpop.permute.xlu0 %321  ;;  %905 = vmatprep.mubr.f32.mxu0 %v2134_v4 }
 0x10b   : > { %v325_v60 = vsel %vm292_vm5, %v322_v57, %v324_v56  ;;  %v326_v61 = vsel %vm292_vm5, %v324_v56, %v322_v57  ;;  %2051 = vmatmul.mubr.msk.f32.vlgmr.msra.gmra.mxu1 %vm334_vm3, %v2048_v55 }
 0x10c   : > { %v327_v62 = vsel %vm2269_vm9, %v325_v60, %v320_v59  ;;  %2058 = vmatpush1.msk.msra.mxu1 %vm338_vm2, %v2209_v9  ;;  %v328_v63 = vsel %vm2265_vm8, %v326_v61, %v319_v58  ;;  %989 = vmatprep.mubr.f32.mxu1 %v2134_v4  ;;  %v330_v5 = vsel %vm2257_vm6, %v319_v58, %v326_v61 }
 0x10d   : > { %2053 = vmatprep.subr.msk.mxu0 %vm338_vm2, %v328_v63  ;;  %v329_v6 = vsel %vm2261_vm7, %v320_v59, %v325_v60 }
 0x10e   : > { %2054 = vmatpush1.msk.msra.mxu0 %vm338_vm2, %v327_v62 }
 0x10f   : > { %2055 = vmatmul.mubr.msk.f32.vlgmr.msra.gmra.mxu0 %vm334_vm3, %v2052_v1  ;;  %2059 = vmatmul.mubr.msk.f32.vlgmr.msra.gmra.mxu1 %vm334_vm3, %v2056_v2 }
 0x110   : > { %2061 = vmatprep.subr.msk.mxu0 %vm338_vm2, %v330_v5  ;;  %1073 = vmatprep.mubr.f32.mxu0 %v2134_v4 }
 0x111   : > { %2062 = vmatpush1.msk.msra.mxu0 %vm338_vm2, %v329_v6  ;;  %1254 = vmatprep.mubr.f32.mxu1 %v2134_v4 }
 0x113   : > { %2063 = vmatmul.mubr.msk.f32.vlgmr.msra.gmra.mxu0 %vm334_vm3, %v2060_v7 }
 0x114   : > { %1334 = vmatprep.mubr.f32.mxu0 %v2134_v4 }
 0x117   : > { %v1086_v41 = vpop.permute.xlu0 %1085 }
 0x149   : > { %v411_v8 = vpop.f32.mrf.mxu0 }
 0x14b   : > { %v413_v9 = vpop.f32.mrf.mxu0 }
 0x1c3   : > { %v491_v10 = vpop.f32.mrf.mxu1  ;;  %v573_v11 = vpop.f32.mrf.mxu0 }
 0x1c4   : > { %v492_v12 = vadd.f32 %v491_v10, %v411_v8 }
 0x1c5   : > { %v493_v13 = vpop.f32.mrf.mxu1  ;;  %v575_v15 = vpop.f32.mrf.mxu0 }
 0x1c6   : > { %v494_v16 = vadd.f32 %v493_v13, %v413_v9  ;;  %v578_v17 = vadd.f32 %v573_v11, %v492_v12 }
 0x1c7   : > { %v657_v18 = vpop.f32.mrf.mxu1 }
 0x1c8   : > { %v579_v19 = vadd.f32 %v575_v15, %v494_v16  ;;  %v662_v20 = vadd.f32 %v657_v18, %v578_v17  ;;  %v739_v21 = vpop.f32.mrf.mxu0 }
 0x1c9   : > { %v659_v22 = vpop.f32.mrf.mxu1 }
 0x1ca   : > { %v663_v23 = vadd.f32 %v659_v22, %v579_v19  ;;  %v744_v24 = vadd.f32 %v739_v21, %v662_v20  ;;  %v741_v26 = vpop.f32.mrf.mxu0  ;;  %v2064_v19 = vld [vmem:[%s2555_s3 + $0x4] sm:$0xf] }
 0x1cb   : > { %v823_v30 = vpop.f32.mrf.mxu1 }
 0x1cc   : > { %v745_v31 = vadd.f32 %v741_v26, %v663_v23  ;;  %v828_v33 = vadd.f32 %v823_v30, %v744_v24 }
 0x1cd   : > { %v825_v32 = vpop.f32.mrf.mxu1 }
 0x1ce   : > { %v829_v36 = vadd.f32 %v825_v32, %v745_v31 }
 0x1cf   : > { %v907_v34 = vpop.f32.mrf.mxu0  ;;  %v991_v35 = vpop.f32.mrf.mxu1 }
 0x1d0   : > { %v912_v37 = vadd.f32 %v907_v34, %v828_v33 }
 0x1d1   : > { %v909_v38 = vpop.f32.mrf.mxu0  ;;  %v993_v42 = vpop.f32.mrf.mxu1 }
 0x1d2   : > { %v996_v39 = vadd.f32 %v991_v35, %v912_v37  ;;  %v913_v40 = vadd.f32 %v909_v38, %v829_v36 }
 0x1d3   : > { %v1075_v43 = vpop.f32.mrf.mxu0 }
 0x1d4   : > { %v997_v44 = vadd.f32 %v993_v42, %v913_v40  ;;  %v1080_v45 = vadd.f32 %v1075_v43, %v996_v39  ;;  %v1178_v42 = vld [vmem:[%s2555_s3] sm:$0xf]  ;;  %v2071_v43 = vld [vmem:[%s2555_s3 + $0x8] sm:$0xf] }
 0x1d5   : > { %v1077_v46 = vpop.f32.mrf.mxu0 }
 0x1d6   : > { %v1081_v47 = vadd.f32 %v1077_v46, %v997_v44  ;;  %v1088_v48 = vadd.f32 %v1086_v41, %v1080_v45 }
 0x1d8   : > { %v1089_v49 = vadd.f32 %v1086_v41, %v1081_v47  ;;  %v1095_v50 = vmul.f32 %v1088_v48, %v1088_v48  ;;  %v1090_v51 = vsel %vm338_vm2, %v1088_v48, 0.0 }
 0x1da   : > { %v1091_v52 = vsel %vm338_vm2, %v1089_v49, 0.0  ;;  %v1096_v53 = vmul.f32 %v1089_v49, %v1089_v49  ;;  %v1097_v55 = vsel %vm338_vm2, %v1095_v50, 0.0 }
 0x1db   : > { %v1092_v54 = vadd.f32 %v1091_v52, %v1090_v51  ;;  %v2075_v52 = vld [vmem:[%s2555_s3 + $0xc] sm:$0xf] }
 0x1dc   : > { %v1098_v56 = vsel %vm338_vm2, %v1096_v53, 0.0  ;;  %v2079_v53 = vld [vmem:[%s2555_s3 + $0x10] sm:$0xf] }
 0x1dd   : > { %1093 = vadd.xlane.f32.xlu1 %v1092_v54  ;;  %v1099_v57 = vadd.f32 %v1098_v56, %v1097_v55 }
 0x1df   : > { %1100 = vadd.xlane.f32.xlu0 %v1099_v57  ;;  %v2083_v57 = vld [vmem:[%s2555_s3 + $0x14] sm:$0xf] }
 0x266   : > { %v1094_v58 = vpop.xlane.xlu1 %1093 }
 0x267   : > { %v1102_v59 = vmul.f32 0.00390625, %v1094_v58 }
 0x268   : > { %v1101_v60 = vpop.xlane.xlu0 %1100 }
 0x269   : > { %v1103_v61 = vmul.f32 0.00390625, %v1101_v60  ;;  %v1104_v62 = vmul.f32 %v1102_v59, %v1102_v59  ;;  %v1106_v2 = vsub.f32 %v1088_v48, %v1102_v59  ;;  %v1107_v5 = vsub.f32 %v1089_v49, %v1102_v59 }
 0x26b   : > { %v1105_v63 = vsub.f32 %v1103_v61, %v1104_v62 }
 0x26d   : > { %v1108_v1 = vadd.f32 1e-05, %v1105_v63 }
 0x26f   : > { %2119 = vrsqrt.f32 %v1108_v1 }
 0x27c   : > { %v2120_v6 = vpop.eup %2119 }
 0x27d   : > { %v1111_v7 = vmul.f32 %v2120_v6, %v1107_v5  ;;  %v1110_v8 = vmul.f32 %v2120_v6, %v1106_v2  ;;  %v2087_v5 = vld [vmem:[%s2555_s3 + $0x18] sm:$0xf]  ;;  %v2095_v6 = vld [vmem:[%s2555_s3 + $0x20] sm:$0xf] }
 0x27f   : > { %v1113_v9 = vmax.f32 %v1111_v7, 0.0  ;;  %v2386_v10 = vmax.f32 %v1110_v8, 0.0 }
 0x281   : > { %1116 = vrot.lane.b32.xlu0 %v1113_v9, %s2132_s25  ;;  %1114 = vrot.lane.b32.xlu1 %v2386_v10, %s2132_s25 }
 0x285   : > { %1146 = vrot.lane.b32.xlu0 %v2386_v10, %s2133_s26  ;;  %1120 = vrot.lane.b32.xlu1 %v2386_v10, %s2131_s24 }
 0x289   : > { %1122 = vrot.lane.b32.xlu1 %v1113_v9, %s2131_s24  ;;  %s224_s24 = scalar_lea.vmem %s2557_s5, %s2101_s20 }
 0x28d   : > { %1148 = vrot.lane.b32.xlu1 %v1113_v9, %s2133_s26 }
 0x2f3   : > { %v1117_v11 = vpop.permute.xlu0 %1116  ;;  %v1115_v12 = vpop.permute.xlu1 %1114 }
 0x2f4   : > { %v1118_v13 = vsel %vm253_vm1, %v1115_v12, %v1117_v11  ;;  %v1119_v17 = vsel %vm253_vm1, %v1117_v11, %v1115_v12 }
 0x2f5   : > { %1132 = vrot.lane.b32.xlu1 %v1118_v13, %s2133_s26  ;;  %2065 = vmatprep.subr.msk.mxu1 %vm338_vm2, %v1118_v13 }
 0x2f7   : > { %v1121_v15 = vpop.permute.xlu1 %1120  ;;  %v1147_v26 = vpop.permute.xlu0 %1146 }
 0x2f9   : > { %1138 = vrot.lane.b32.xlu1 %v1118_v13, %s2135_s29 }
 0x2fb   : > { %v1123_v16 = vpop.permute.xlu1 %1122 }
 0x2fc   : > { %v2406_v18 = vsel %vm274_vm0, %v1121_v15, %v1123_v16  ;;  %v1125_v20 = vsel %vm274_vm0, %v1123_v16, %v1121_v15 }
 0x2fd   : > { %1154 = vrot.lane.b32.xlu1 %v1113_v9, %s2135_s29  ;;  %v1126_v21 = vsel %vm253_vm1, %v2406_v18, %v1119_v17  ;;  %v1129_v22 = vsel %vm256_vm4, %v1118_v13, %v1125_v20 }
 0x2fe   : > { %1130 = vrot.lane.b32.xlu0 %v1126_v21, %s2133_s26  ;;  %2066 = vmatpush1.msk.msra.mxu1 %vm338_vm2, %v1126_v21 }
 0x2ff   : > { %2067 = vmatmul.mubr.msk.f32.vlgmr.msra.gmra.mxu1 %vm334_vm3, %v2064_v19  ;;  %v1149_v23 = vpop.permute.xlu1 %1148 }
 0x300   : > { %1416 = vmatprep.mubr.f32.mxu1 %v2134_v4  ;;  %v1150_v44 = vsel %vm285_vm10, %v1147_v26, %v1149_v23  ;;  %v1151_v46 = vsel %vm285_vm10, %v1149_v23, %v1147_v26 }
 0x301   : > { %1164 = vrot.lane.b32.xlu1 %v1129_v22, %s2133_s26 }
 0x302   : > { %1136 = vrot.lane.b32.xlu0 %v1126_v21, %s2135_s29 }
 0x305   : > { %1170 = vrot.lane.b32.xlu1 %v1129_v22, %s2135_s29 }
 0x306   : > { %1152 = vrot.lane.b32.xlu0 %v2386_v10, %s2135_s29 }
 0x30a   : > { %1162 = vrot.lane.b32.xlu0 %v2406_v18, %s2133_s26 }
 0x30e   : > { %1168 = vrot.lane.b32.xlu0 %v2406_v18, %s2135_s29 }
 0x312   : > { %1932 = vperm.xlu0 %2117, %v1929_v14  }
 0x367   : > { %v1133_v24 = vpop.permute.xlu1 %1132 }
 0x36b   : > { %v1139_v30 = vpop.permute.xlu1 %1138 }
 0x36f   : > { %v1155_v32 = vpop.permute.xlu1 %1154 }
 0x370   : > { %v1131_v31 = vpop.permute.xlu0 %1130 }
 0x371   : > { %v1134_v34 = vsel %vm285_vm10, %v1131_v31, %v1133_v24  ;;  %v1135_v35 = vsel %vm285_vm10, %v1133_v24, %v1131_v31 }
 0x373   : > { %v1165_v49 = vpop.permute.xlu1 %1164 }
 0x374   : > { %v1137_v33 = vpop.permute.xlu0 %1136 }
 0x375   : > { %v1140_v36 = vsel %vm292_vm5, %v1137_v33, %v1139_v30  ;;  %v1141_v37 = vsel %vm292_vm5, %v1139_v30, %v1137_v33 }
 0x376   : > { %v1142_v38 = vsel %vm2269_vm9, %v1140_v36, %v1135_v35  ;;  %v1144_v39 = vsel %vm2261_vm7, %v1135_v35, %v1140_v36  ;;  %v1143_v40 = vsel %vm2265_vm8, %v1141_v37, %v1134_v34  ;;  %v1145_v41 = vsel %vm2257_vm6, %v1134_v34, %v1141_v37 }
 0x377   : > { %2068 = vmatprep.subr.msk.mxu0 %vm338_vm2, %v1143_v40  ;;  %2072 = vmatprep.subr.msk.mxu1 %vm338_vm2, %v1145_v41  ;;  %v1171_v58 = vpop.permute.xlu1 %1170 }
 0x378   : > { %v1153_v45 = vpop.permute.xlu0 %1152  ;;  %2069 = vmatpush1.msk.msra.mxu0 %vm338_vm2, %v1142_v38  ;;  %2073 = vmatpush1.msk.msra.mxu1 %vm338_vm2, %v1144_v39 }
 0x379   : > { %v1156_v47 = vsel %vm292_vm5, %v1153_v45, %v1155_v32  ;;  %v1157_v48 = vsel %vm292_vm5, %v1155_v32, %v1153_v45  ;;  %2070 = vmatmul.mubr.msk.f32.vlgmr.msra.gmra.mxu0 %vm334_vm3, %v1178_v42  ;;  %2080 = vmatprep.subr.msk.mxu1 %vm338_vm2, %v1113_v9 }
 0x37a   : > { %v1158_v50 = vsel %vm2269_vm9, %v1156_v47, %v1151_v46  ;;  %2074 = vmatmul.mubr.msk.f32.vlgmr.msra.gmra.mxu1 %vm334_vm3, %v2071_v43  ;;  %v1159_v51 = vsel %vm2265_vm8, %v1157_v48, %v1150_v44  ;;  %1500 = vmatprep.mubr.f32.mxu0 %v2134_v4  ;;  %v1161_v55 = vsel %vm2257_vm6, %v1150_v44, %v1157_v48 }
 0x37b   : > { %2081 = vmatpush1.msk.msra.mxu1 %vm338_vm2, %v2386_v10  ;;  %2076 = vmatprep.subr.msk.mxu0 %vm338_vm2, %v1159_v51  ;;  %v1160_v56 = vsel %vm2261_vm7, %v1151_v46, %v1156_v47 }
 0x37c   : > { %v1163_v54 = vpop.permute.xlu0 %1162  ;;  %2077 = vmatpush1.msk.msra.mxu0 %vm338_vm2, %v1158_v50  ;;  %1584 = vmatprep.mubr.f32.mxu1 %v2134_v4 }
 0x37d   : > { %2078 = vmatmul.mubr.msk.f32.vlgmr.msra.gmra.mxu0 %vm334_vm3, %v2075_v52  ;;  %2084 = vmatprep.subr.msk.mxu0 %vm338_vm2, %v1161_v55  ;;  %v1166_v60 = vsel %vm285_vm10, %v1163_v54, %v1165_v49  ;;  %v1167_v61 = vsel %vm285_vm10, %v1165_v49, %v1163_v54 }
 0x37e   : > { %2085 = vmatpush1.msk.msra.mxu0 %vm338_vm2, %v1160_v56  ;;  %2082 = vmatmul.mubr.msk.f32.vlgmr.msra.gmra.mxu1 %vm334_vm3, %v2079_v53 }
 0x37f   : > { %2092 = vmatprep.subr.msk.mxu0 %vm338_vm2, %v1129_v22  ;;  %1668 = vmatprep.mubr.f32.mxu0 %v2134_v4 }
 0x380   : > { %v1169_v59 = vpop.permute.xlu0 %1168  ;;  %1752 = vmatprep.mubr.f32.mxu1 %v2134_v4 }
 0x381   : > { %v1172_v62 = vsel %vm292_vm5, %v1169_v59, %v1171_v58  ;;  %v1173_v63 = vsel %vm292_vm5, %v1171_v58, %v1169_v59  ;;  %2086 = vmatmul.mubr.msk.f32.vlgmr.msra.gmra.mxu0 %vm334_vm3, %v2083_v57 }
 0x382   : > { %v1174_v1 = vsel %vm2269_vm9, %v1172_v62, %v1167_v61  ;;  %2093 = vmatpush1.msk.msra.mxu0 %vm338_vm2, %v2406_v18  ;;  %v1175_v2 = vsel %vm2265_vm8, %v1173_v63, %v1166_v60  ;;  %1836 = vmatprep.mubr.f32.mxu0 %v2134_v4  ;;  %v1177_v29 = vsel %vm2257_vm6, %v1166_v60, %v1173_v63 }
 0x383   : > { %2088 = vmatprep.subr.msk.mxu1 %vm338_vm2, %v1175_v2  ;;  %v1176_v28 = vsel %vm2261_vm7, %v1167_v61, %v1172_v62 }
 0x384   : > { %2089 = vmatpush1.msk.msra.mxu1 %vm338_vm2, %v1174_v1 }
 0x385   : > { %2090 = vmatmul.mubr.msk.f32.vlgmr.msra.gmra.mxu1 %vm334_vm3, %v2087_v5  ;;  %2096 = vmatprep.subr.msk.mxu1 %vm338_vm2, %v1177_v29 }
 0x386   : > { %2097 = vmatpush1.msk.msra.mxu1 %vm338_vm2, %v1176_v28  ;;  %2094 = vmatmul.mubr.msk.f32.vlgmr.msra.gmra.mxu0 %vm334_vm3, %v2091_v3 }
 0x387   : > { %1920 = vmatprep.mubr.f32.mxu1 %v2134_v4 }
 0x389   : > { %2098 = vmatmul.mubr.msk.f32.vlgmr.msra.gmra.mxu1 %vm334_vm3, %v2095_v6 }
 0x38d   : > { %v1933_v40 = vpop.permute.xlu0 %1932 }
 0x3bf   : > { %v1256_v25 = vpop.f32.mrf.mxu1 }
 0x3c1   : > { %v1258_v7 = vpop.f32.mrf.mxu1 }
 0x439   : > { %v1336_v27 = vpop.f32.mrf.mxu0 }
 0x43a   : > { %v1337_v8 = vadd.f32 %v1336_v27, %v1256_v25  ;;  %v1418_v9 = vpop.f32.mrf.mxu1 }
 0x43b   : > { %v1338_v10 = vpop.f32.mrf.mxu0 }
 0x43c   : > { %v1339_v11 = vadd.f32 %v1338_v10, %v1258_v7  ;;  %v1423_v12 = vadd.f32 %v1418_v9, %v1337_v8  ;;  %v1420_v13 = vpop.f32.mrf.mxu1 }
 0x43d   : > { %v1502_v15 = vpop.f32.mrf.mxu0 }
 0x43e   : > { %v1424_v16 = vadd.f32 %v1420_v13, %v1339_v11  ;;  %v1507_v17 = vadd.f32 %v1502_v15, %v1423_v12  ;;  %v1586_v18 = vpop.f32.mrf.mxu1 }
 0x43f   : > { %v1504_v19 = vpop.f32.mrf.mxu0 }
 0x440   : > { %v1508_v20 = vadd.f32 %v1504_v19, %v1424_v16  ;;  %v1591_v21 = vadd.f32 %v1586_v18, %v1507_v17  ;;  %v1588_v22 = vpop.f32.mrf.mxu1 }
 0x441   : > { %v1670_v4 = vpop.f32.mrf.mxu0 }
 0x442   : > { %v1592_v14 = vadd.f32 %v1588_v22, %v1508_v20  ;;  %v1675_v24 = vadd.f32 %v1670_v4, %v1591_v21 }
 0x443   : > { %v1672_v23 = vpop.f32.mrf.mxu0 }
 0x444   : > { %v1676_v30 = vadd.f32 %v1672_v23, %v1592_v14 }
 0x445   : > { %v1754_v26 = vpop.f32.mrf.mxu1 }
 0x446   : > { %v1759_v31 = vadd.f32 %v1754_v26, %v1675_v24  ;;  %v1838_v32 = vpop.f32.mrf.mxu0 }
 0x447   : > { %v1756_v33 = vpop.f32.mrf.mxu1 }
 0x448   : > { %v1760_v34 = vadd.f32 %v1756_v33, %v1676_v30  ;;  %v1843_v35 = vadd.f32 %v1838_v32, %v1759_v31  ;;  %v1840_v36 = vpop.f32.mrf.mxu0 }
 0x449   : > { %v1922_v37 = vpop.f32.mrf.mxu1 }
 0x44a   : > { %v1844_v38 = vadd.f32 %v1840_v36, %v1760_v34  ;;  %v1927_v39 = vadd.f32 %v1922_v37, %v1843_v35 }
 0x44b   : > { %v1924_v41 = vpop.f32.mrf.mxu1 }
 0x44c   : > { %v1935_v42 = vadd.f32 %v1933_v40, %v1927_v39  ;;  %v1928_v43 = vadd.f32 %v1924_v41, %v1844_v38 }
 0x44e   : > { %v1936_v44 = vadd.f32 %v1933_v40, %v1928_v43  ;;  %v1942_v45 = vmul.f32 %v1935_v42, %v1935_v42  ;;  %v1937_v46 = vsel %vm338_vm2, %v1935_v42, 0.0 }
 0x450   : > { %v1938_v47 = vsel %vm338_vm2, %v1936_v44, 0.0  ;;  %v1943_v48 = vmul.f32 %v1936_v44, %v1936_v44  ;;  %v1944_v50 = vsel %vm338_vm2, %v1942_v45, 0.0 }
 0x451   : > { %v1939_v49 = vadd.f32 %v1938_v47, %v1937_v46 }
 0x452   : > { %v1945_v51 = vsel %vm338_vm2, %v1943_v48, 0.0 }
 0x453   : > { %1940 = vadd.xlane.f32.xlu1 %v1939_v49  ;;  %v1946_v52 = vadd.f32 %v1945_v51, %v1944_v50 }
 0x455   : > { %1947 = vadd.xlane.f32.xlu0 %v1946_v52 }
 0x4dc   : > { %v1941_v53 = vpop.xlane.xlu1 %1940 }
 0x4dd   : > { %v1949_v54 = vmul.f32 0.00390625, %v1941_v53 }
 0x4de   : > { %v1948_v55 = vpop.xlane.xlu0 %1947 }
 0x4df   : > { %v1950_v56 = vmul.f32 0.00390625, %v1948_v55  ;;  %v1951_v57 = vmul.f32 %v1949_v54, %v1949_v54  ;;  %v1953_v60 = vsub.f32 %v1935_v42, %v1949_v54  ;;  %v1954_v61 = vsub.f32 %v1936_v44, %v1949_v54 }
 0x4e1   : > { %v1952_v58 = vsub.f32 %v1950_v56, %v1951_v57 }
 0x4e3   : > { %v1955_v59 = vadd.f32 1e-05, %v1952_v58 }
 0x4e5   : > { %2121 = vrsqrt.f32 %v1955_v59 }
 0x4f2   : > { %v2122_v62 = vpop.eup %2121 }
 0x4f3   : > { %v1957_v63 = vmul.f32 %v2122_v62, %v1953_v60  ;;  %v1958_v1 = vmul.f32 %v2122_v62, %v1954_v61 }
 0x4f5   : > { %v1961_v2 = vcombine.low %v1957_v63, %v1958_v1 }
 0x4f7   : > { %v1963_v5 = vadd.f32 %v1961_v2, %v2183_v0 }
 0x4f9   : > { %1964 = vst [vmem:[%s224_s24] sm:$0xff] %v1963_v5 }
 0x4fa PF: > { %s15_s18 = sadd.s32 1, %s2129_s18  }
 0x4fb   : > { %p12_p4 = scmp.ge.s32.totalorder %s15_s18, 4  }
 0x4fd   :  { %14 = sbr.rel (!%p12_p4) target bundleno = 1 (0x1), region = 86 }

</bundles_post_ra>
